<compile_context>
chip_gen: v5e
topology: v5e:2x2
jax: 0.10.0
libtpu: 0.0.40
codegen_flags: <defaults>
</compile_context>

<pallas_src>
import numpy as np
import jax
import jax.numpy as jnp
from jax.experimental import pallas as pl
from jax.experimental.pallas import tpu as pltpu


# ----------------------------- Pallas kernel ------------------------------ #

def metanet_linearized_kernel(x_ref, wall_ref, b0_ref, w1_ref, b1_ref,
                              w2_ref, b2_ref, db_ref, o_ref, acc_ref):
    """Streaming fused matmul over Din + once-per-tile epilogue.

    Shapes (per block):
      x_ref    : [Bt, Tk]           flattened image tile (bf16 or f32)
      wall_ref : [Tk, (T+1)*F]      [w0t | dW_0 | ... | dW_{T-1}] tile
      b0_ref   : [1, F]   f32       base bias
      w1_ref   : [F, Hd]  f32       meta-net layer 1 (transposed)
      b1_ref   : [1, Hd]  f32
      w2_ref   : [Hd, T]  f32       meta-net layer 2 (transposed)
      b2_ref   : [1, T]   f32
      db_ref   : [T, F]   f32       task-vector bias deltas
      o_ref    : [Bt, F]  f32       outputs
      acc_ref  : [Bt, (T+1)*F] f32  VMEM accumulator (persists across K steps)
    """
    k = pl.program_id(1)

    @pl.when(k == 0)
    def _init():
        acc_ref[...] = jnp.zeros_like(acc_ref)

    # One lane-dense streaming matmul covers base features AND all T jvp terms.
    # Keep the `+=` form so Mosaic can lower to an in-place MXU accumulate; no
    # extra temporaries / VMEM stores on the hot path (v5e single store slot).
    acc_ref[...] += jnp.dot(x_ref[...], wall_ref[...],
                            preferred_element_type=jnp.float32)

    @pl.when(k == pl.num_programs(1) - 1)
    def _epilogue():
        F = o_ref.shape[1]
        T = db_ref.shape[0]

        # base_features = func0(params0, x)
        # Slice the scratch ref directly (no full [Bt,(T+1)*F] materialization)
        # to keep the live vreg set small at production bt / F.
        base = acc_ref[:, :F] + b0_ref[...]                     # [Bt, F]

        # meta_net: Linear -> ReLU -> Linear  (coefficients, non-blockwise)
        h = jnp.maximum(
            jnp.dot(base, w1_ref[...], preferred_element_type=jnp.float32)
            + b1_ref[...], 0.0)
        coef = (jnp.dot(h, w2_ref[...], preferred_element_type=jnp.float32)
                + b2_ref[...])                                  # [Bt, T]

        # jvp tangent term: coef @ db + sum_t coef_t * (x @ dW_t)
        dp = jnp.dot(coef, db_ref[...], preferred_element_type=jnp.float32)
        for t in range(T):                                      # T is small/static
            dp = dp + coef[:, t:t + 1] * acc_ref[:, (t + 1) * F:(t + 2) * F]

        o_ref[...] = (base + dp).astype(o_ref.dtype)


# --------------------------- Sizing helpers -------------------------------- #

def _round_up(x, m):
    return (x + m - 1) // m * m


def _vmem_capacity_bytes():
    """Physical VMEM per TensorCore (128 MiB v5e/v6e, 64 MiB v7x).

    Conservative 64 MiB fallback if the query is unavailable, so derived tile
    budgets are legal on every generation."""
    try:
        info = pltpu.get_tpu_info()
        cap = int(getattr(info, "vmem_capacity_bytes"))
        if cap > 0:
            return cap
    except Exception:
        pass
    return 64 << 20


def _largest_divisor(n, cap, multiple_of=1):
    """Largest d <= cap with d % multiple_of == 0 and n % d == 0 (or None)."""
    best = None
    d = multiple_of
    limit = min(n, max(cap, multiple_of))
    while d <= limit:
        if n % d == 0:
            best = d
        d += multiple_of
    return best


# ------------------------- One-time weight packing ------------------------- #

def pack_metanet_params(params, *, weight_dtype=jnp.bfloat16):
    """Host-side packing, hoisted out of the forward (do this ONCE and cache).

    Builds the lane-dense streamed weight
        W_all = [w0t | dW_0 | ... | dW_{T-1}]   with shape [Din_pad, (T+1)*F]
    (Din zero-padded to a multiple of 128) plus the small f32 operands.
    """
    (w0t, b0, w1t, b1, w2t, b2, dwt, db) = params
    Din, F = w0t.shape
    T = dwt.shape[0]
    Hd = w1t.shape[1]

    dw_cat = jnp.transpose(dwt, (1, 0, 2)).reshape(Din, T * F)        # [Din, T*F]
    w_all = jnp.concatenate([w0t, dw_cat], axis=1).astype(weight_dtype)
    Din_pad = _round_up(Din, 128)
    if Din_pad != Din:
        w_all = jnp.pad(w_all, ((0, Din_pad - Din), (0, 0)))          # zero rows

    packed = {
        "w_all": w_all,
        "b0": jnp.asarray(b0, jnp.float32),
        "w1t": jnp.asarray(w1t, jnp.float32),
        "b1": jnp.asarray(b1, jnp.float32),
        "w2t": jnp.asarray(w2t, jnp.float32),
        "b2": jnp.asarray(b2, jnp.float32),
        "db": jnp.asarray(db, jnp.float32),
        "din": Din, "din_pad": Din_pad,
        "feat_dim": F, "num_tv": T, "hidden_dim": Hd,
        "weight_dtype": weight_dtype,
    }
    return packed


# ------------------------------- Forward ----------------------------------- #

def metanet_linearized_forward(x_nchw, packed, *, b_tile=None, k_tile=None,
                               weight_buffers=2):
    """x_nchw: [B, 3, H, W] float32. `packed` from pack_metanet_params.
    Returns [B, feat_dim] float32."""
    w_all = packed["w_all"]
    b0, w1t, b1 = packed["b0"], packed["w1t"], packed["b1"]
    w2t, b2, db = packed["w2t"], packed["b2"], packed["db"]
    Din, Din_pad = packed["din"], packed["din_pad"]
    F, T, Hd = packed["feat_dim"], packed["num_tv"], packed["hidden_dim"]
    wdt = packed["weight_dtype"]
    itemsize = jnp.dtype(wdt).itemsize
    n_all = (T + 1) * F

    B = x_nchw.shape[0]
    # NOTE: for very long production Din, consider keeping x in f32 and only
    # streaming W_all in bf16 (accumulation is f32 either way).
    x_flat = x_nchw.reshape(B, -1).astype(wdt)                        # [B, Din]
    if Din_pad != Din:
        x_flat = jnp.pad(x_flat, ((0, 0), (0, Din_pad - Din)))

    # -------- generation-aware VMEM budgeting --------
    vmem_phys = _vmem_capacity_bytes()
    # scoped cap we are willing to request: ~5/8 of physical, hard-capped 96MiB
    # (=> ~80 MiB on 128 MiB v5e/v6e, ~40 MiB on 64 MiB v7x).
    vmem_cap = min(vmem_phys * 5 // 8, 96 << 20)
    small_bytes = (F * Hd + Hd * T + F + Hd + T + T * F + 2 * Hd) * 4
    budget = max(vmem_cap - 2 * small_bytes - (2 << 20), 4 << 20)

    # -------- batch tile --------
    if b_tile is None:
        # f32 accumulator + double-buffered x/out rows must fit ~1/3 of budget.
        cap_bt = max(8, budget // 3 // max(n_all * 4 + 2 * F * 4, 1))
        cap_bt = min(cap_bt, 256, B)
        bt = _largest_divisor(B, cap_bt) or B
        # Keep >=2 steps on the "parallel" grid axis (v7x has 2 TensorCores)
        # when halving does not break sublane alignment.
        if B // bt == 1 and bt % 16 == 0:
            bt //= 2
    else:
        bt = b_tile
    assert B % bt == 0

    # -------- K (Din) tile --------
    fixed = bt * n_all * 4 + 2 * bt * F * 4 + 2 * small_bytes
    if k_tile is None:
        per_row = weight_buffers * n_all * itemsize + 2 * bt * itemsize
        cap_tk = max(128, (budget - fixed) // max(per_row, 1))
        tk = _largest_divisor(Din_pad, cap_tk, multiple_of=128) or Din_pad
    else:
        tk = k_tile
    assert Din_pad % tk == 0 and (tk == Din_pad or tk % 128 == 0)
    ksteps = Din_pad // tk
    grid = (B // bt, ksteps)

    # -------- VMEM limit & cost estimate --------
    need = (weight_buffers * tk * n_all * itemsize         # W_all buffers
            + 2 * bt * tk * itemsize                        # x double buffers
            + bt * n_all * 4                                # f32 accumulator
            + 2 * bt * F * 4                                # out double buffers
            + 2 * small_bytes + (1 << 20))
    vmem_limit = int(min(max(need, 8 << 20), vmem_cap))

    # W_all is DMA'd once when resident (ksteps == 1), else once per batch tile.
    w_streams = 1 if ksteps == 1 else (B // bt)
    cost = pl.CostEstimate(
        flops=2 * B * Din_pad * n_all + 2 * B * (F * Hd + Hd * T + 2 * T * F),
        transcendentals=0,
        bytes_accessed=(x_flat.size * itemsize
                        + w_streams * w_all.size * itemsize
                        + small_bytes + B * F * 4))

    # Optional deeper buffering of the weight stream (only useful if a trace
    # shows exposed DMA; default stays at standard double buffering).
    w_spec_kwargs = {}
    if weight_buffers != 2 and ksteps > 1:
        w_spec_kwargs["pipeline_mode"] = pl.Buffered(weight_buffers)

    grid_spec = pltpu.PrefetchScalarGridSpec(
        num_scalar_prefetch=0,
        grid=grid,
        in_specs=[
            pl.BlockSpec((bt, tk), lambda b, k: (b, k)),                 # x
            pl.BlockSpec((tk, n_all), lambda b, k: (k, 0),               # W_all
                         **w_spec_kwargs),
            pl.BlockSpec((1, F), lambda b, k: (0, 0)),                   # b0
            pl.BlockSpec((F, Hd), lambda b, k: (0, 0)),                  # w1t
            pl.BlockSpec((1, Hd), lambda b, k: (0, 0)),                  # b1
            pl.BlockSpec((Hd, T), lambda b, k: (0, 0)),                  # w2t
            pl.BlockSpec((1, T), lambda b, k: (0, 0)),                   # b2
            pl.BlockSpec((T, F), lambda b, k: (0, 0)),                   # db
        ],
        out_specs=pl.BlockSpec((bt, F), lambda b, k: (b, 0)),
        scratch_shapes=[pltpu.VMEM((bt, n_all), jnp.float32)],
    )

    return pl.pallas_call(
        metanet_linearized_kernel,
        out_shape=jax.ShapeDtypeStruct((B, F), jnp.float32),
        grid_spec=grid_spec,
        compiler_params=pltpu.CompilerParams(
            dimension_semantics=("parallel", "arbitrary"),
            vmem_limit_bytes=vmem_limit),
        cost_estimate=cost,
    )(x_flat, w_all, b0, w1t, b1, w2t, b2, db)


# --------------------------- Pure-JAX reference ---------------------------- #

def reference_forward(x_nchw, params):
    """Mirrors the PyTorch per-sample loop semantics (blockwise=False), f32."""
    (w0t, b0, w1t, b1, w2t, b2, dwt, db) = params
    B = x_nchw.shape[0]
    x_flat = x_nchw.reshape(B, -1).astype(jnp.float32)
    base = x_flat @ w0t + b0                                            # func0
    h = jnp.maximum(base @ w1t + b1, 0.0)
    coef = h @ w2t + b2                                                 # [B, T]
    outs = []
    for i in range(B):
        dW = jnp.einsum('t,tdf->df', coef[i], dwt)                      # sum_t c*dW_t
        dbias = jnp.einsum('t,tf->f', coef[i], db)
        out = x_flat[i:i + 1] @ w0t + b0                                # func0(params0, x_i)
        dp = x_flat[i:i + 1] @ dW + dbias                               # jvp tangent term
        outs.append(out + dp)
    return jnp.concatenate(outs, axis=0)


# --------------------------------- Main ------------------------------------ #

if __name__ == "__main__":
    # Small shapes consistent with the module's forward: x is [B, 3, H, W].
    B, C, H, W = 2, 3, 16, 16
    Din = C * H * W                  # 768
    feat_dim = 32                    # detected feature dimension of func0
    num_task_vectors = 4
    hidden_dim = max(feat_dim // 4, num_task_vectors)   # MetaNet default: 8

    key = jax.random.PRNGKey(0)
    keys = jax.random.split(key, 10)

    # Input images
    x = jax.random.normal(keys[0], (B, C, H, W), dtype=jnp.float32)

    # params0 of the linearized base model (stored transposed for x @ W)
    w0t = jax.random.normal(keys[1], (Din, feat_dim), dtype=jnp.float32) * 0.02
    b0 = jax.random.normal(keys[2], (1, feat_dim), dtype=jnp.float32) * 0.02

    # MetaNet weights (nn.init.normal_(std=0.01) on layer 0; synthetic small
    # normals elsewhere — no checkpoint).
    w1t = jax.random.normal(keys[3], (feat_dim, hidden_dim), dtype=jnp.float32) * 0.01
    b1 = jax.random.normal(keys[4], (1, hidden_dim), dtype=jnp.float32) * 0.01
    w2t = jax.random.normal(keys[5], (hidden_dim, num_task_vectors), dtype=jnp.float32) * 0.05
    b2 = jax.random.normal(keys[6], (1, num_task_vectors), dtype=jnp.float32) * 0.05

    # Task vectors: per-task deltas for (W0, b0)
    dwt = jax.random.normal(keys[7], (num_task_vectors, Din, feat_dim),
                            dtype=jnp.float32) * 0.01
    db = jax.random.normal(keys[8], (num_task_vectors, feat_dim),
                           dtype=jnp.float32) * 0.01

    params = (w0t, b0, w1t, b1, w2t, b2, dwt, db)

    ref = reference_forward(x, params)

    # One-time packing (hoisted out of the forward; cache and reuse per call).
    packed_f32 = pack_metanet_params(params, weight_dtype=jnp.float32)
    packed_bf16 = pack_metanet_params(params, weight_dtype=jnp.bfloat16)
    jax.block_until_ready((packed_f32["w_all"], packed_bf16["w_all"]))

    # f32 streamed weights with k_tile=256 -> 3 reduction steps: tight check of
    # the gridded/pipelined path (init / accumulate / epilogue).
    out_f32 = jax.block_until_ready(
        metanet_linearized_forward(x, packed_f32, k_tile=256))
    np.testing.assert_allclose(np.asarray(out_f32), np.asarray(ref),
                               rtol=1e-4, atol=1e-4)

    # bf16 weights, auto-sized tiles (production config): W_all fits the VMEM
    # budget so it is fully resident (single DMA, K axis collapses to 1 step).
    out_bf16 = jax.block_until_ready(
        metanet_linearized_forward(x, packed_bf16))
    np.testing.assert_allclose(np.asarray(out_bf16), np.asarray(ref),
                               rtol=3e-2, atol=3e-2)

    # TODO(synk): blockwise=True coefficients, training-time causal intervention
    # (zero/perturb) and compute_intervention_loss are not implemented; default
    # (inference, blockwise=False) forward path only.
    print("KERNEL_OK")
</pallas_src>

<mosaic_0001>
module attributes {stable_mosaic.version = 11 : i64} {
  func.func @metanet_linearized_kernel(%arg0: i32, %arg1: i32, %arg2: memref<2x256xf32, #tpu.memory_space<vmem>>, %arg3: memref<256x160xf32, #tpu.memory_space<vmem>>, %arg4: memref<1x32xf32, #tpu.memory_space<vmem>>, %arg5: memref<32x8xf32, #tpu.memory_space<vmem>>, %arg6: memref<1x8xf32, #tpu.memory_space<vmem>>, %arg7: memref<8x4xf32, #tpu.memory_space<vmem>>, %arg8: memref<1x4xf32, #tpu.memory_space<vmem>>, %arg9: memref<4x32xf32, #tpu.memory_space<vmem>>, %arg10: memref<2x32xf32, #tpu.memory_space<vmem>>, %arg11: memref<2x160xf32, #tpu.memory_space<vmem>>) attributes {dimension_semantics = [#tpu.dimension_semantics<parallel>, #tpu.dimension_semantics<arbitrary>], iteration_bounds = array<i64: 1, 3>, scalar_prefetch = 0 : i64, scratch_operands = 1 : i64, tpu.core_type = #tpu.core_type<tc>, window_params = [{transform_indices = @transform_0, window_bounds = array<i64: 2, 256>}, {transform_indices = @transform_1, window_bounds = array<i64: 256, 160>}, {pipeline_mode = #tpu.pipeline_mode<synchronous>, transform_indices = @transform_2, window_bounds = array<i64: 1, 32>}, {pipeline_mode = #tpu.pipeline_mode<synchronous>, transform_indices = @transform_3, window_bounds = array<i64: 32, 8>}, {pipeline_mode = #tpu.pipeline_mode<synchronous>, transform_indices = @transform_4, window_bounds = array<i64: 1, 8>}, {pipeline_mode = #tpu.pipeline_mode<synchronous>, transform_indices = @transform_5, window_bounds = array<i64: 8, 4>}, {pipeline_mode = #tpu.pipeline_mode<synchronous>, transform_indices = @transform_6, window_bounds = array<i64: 1, 4>}, {pipeline_mode = #tpu.pipeline_mode<synchronous>, transform_indices = @transform_7, window_bounds = array<i64: 4, 32>}, {transform_indices = @transform_8, window_bounds = array<i64: 2, 32>}]} {
    %c0_i32 = arith.constant 0 : i32
    %0 = arith.cmpi eq, %arg1, %c0_i32 : i32
    %1 = arith.extui %0 : i1 to i32
    %c0_i32_0 = arith.constant 0 : i32
    %2 = arith.cmpi ne, %1, %c0_i32_0 : i32
    scf.if %2 {
      %cst_9 = arith.constant 0.000000e+00 : f32
      %12 = vector.broadcast %cst_9 : f32 to vector<2x160xf32>
      %c0_10 = arith.constant 0 : index
      %c0_11 = arith.constant 0 : index
      %13 = vector.load %arg11[%c0_10, %c0_11] : memref<2x160xf32, #tpu.memory_space<vmem>>, vector<2x160xf32>
      tpu.vector_store %arg11[%c0_10, %c0_11], %12 {strides = array<i32>} : memref<2x160xf32, #tpu.memory_space<vmem>>, vector<2x160xf32>,
    } else {
    }
    %c0 = arith.constant 0 : index
    %c0_1 = arith.constant 0 : index
    %3 = vector.load %arg11[%c0, %c0_1] : memref<2x160xf32, #tpu.memory_space<vmem>>, vector<2x160xf32>
    %c0_2 = arith.constant 0 : index
    %c0_3 = arith.constant 0 : index
    %4 = vector.load %arg2[%c0_2, %c0_3] : memref<2x256xf32, #tpu.memory_space<vmem>>, vector<2x256xf32>
    %c0_4 = arith.constant 0 : index
    %c0_5 = arith.constant 0 : index
    %5 = vector.load %arg3[%c0_4, %c0_5] : memref<256x160xf32, #tpu.memory_space<vmem>>, vector<256x160xf32>
    %cst = arith.constant dense<0.000000e+00> : vector<2x160xf32>
    %6 = tpu.matmul %4, %5, %cst {dimension_numbers = #tpu.dot_dimension_numbers<[1], [0], [0], [1], [0, 0, 1, 1], [], []>} : vector<2x256xf32>, vector<256x160xf32>, vector<2x160xf32> -> vector<2x160xf32>
    %7 = arith.addf %3, %6 : vector<2x160xf32>
    %c0_6 = arith.constant 0 : index
    %c0_7 = arith.constant 0 : index
    %8 = vector.load %arg11[%c0_6, %c0_7] : memref<2x160xf32, #tpu.memory_space<vmem>>, vector<2x160xf32>
    tpu.vector_store %arg11[%c0_6, %c0_7], %7 {strides = array<i32>} : memref<2x160xf32, #tpu.memory_space<vmem>>, vector<2x160xf32>,
    %c2_i32 = arith.constant 2 : i32
    %9 = arith.cmpi eq, %arg1, %c2_i32 : i32
    %10 = arith.extui %9 : i1 to i32
    %c0_i32_8 = arith.constant 0 : i32
    %11 = arith.cmpi ne, %10, %c0_i32_8 : i32
    scf.if %11 {
      %c0_9 = arith.constant 0 : index
      %c0_10 = arith.constant 0 : index
      %12 = vector.load %arg11[%c0_9, %c0_10] : memref<2x160xf32, #tpu.memory_space<vmem>>, vector<2x32xf32>
      %c0_11 = arith.constant 0 : index
      %c0_12 = arith.constant 0 : index
      %13 = vector.load %arg4[%c0_11, %c0_12] : memref<1x32xf32, #tpu.memory_space<vmem>>, vector<1x32xf32>
      %14 = vector.broadcast %13 : vector<1x32xf32> to vector<2x32xf32>
      %15 = arith.addf %12, %14 : vector<2x32xf32>
      %c0_13 = arith.constant 0 : index
      %c0_14 = arith.constant 0 : index
      %16 = vector.load %arg5[%c0_13, %c0_14] : memref<32x8xf32, #tpu.memory_space<vmem>>, vector<32x8xf32>
      %cst_15 = arith.constant dense<0.000000e+00> : vector<2x8xf32>
      %17 = tpu.matmul %15, %16, %cst_15 {dimension_numbers = #tpu.dot_dimension_numbers<[1], [0], [0], [1], [0, 0, 1, 1], [], []>} : vector<2x32xf32>, vector<32x8xf32>, vector<2x8xf32> -> vector<2x8xf32>
      %c0_16 = arith.constant 0 : index
      %c0_17 = arith.constant 0 : index
      %18 = vector.load %arg6[%c0_16, %c0_17] : memref<1x8xf32, #tpu.memory_space<vmem>>, vector<1x8xf32>
      %19 = vector.broadcast %18 : vector<1x8xf32> to vector<2x8xf32>
      %20 = arith.addf %17, %19 : vector<2x8xf32>
      %cst_18 = arith.constant 0.000000e+00 : f32
      %21 = vector.broadcast %cst_18 : f32 to vector<2x8xf32>
      %22 = arith.maximumf %20, %21 : vector<2x8xf32>
      %c0_19 = arith.constant 0 : index
      %c0_20 = arith.constant 0 : index
      %23 = vector.load %arg7[%c0_19, %c0_20] : memref<8x4xf32, #tpu.memory_space<vmem>>, vector<8x4xf32>
      %cst_21 = arith.constant dense<0.000000e+00> : vector<2x4xf32>
      %24 = tpu.matmul %22, %23, %cst_21 {dimension_numbers = #tpu.dot_dimension_numbers<[1], [0], [0], [1], [0, 0, 1, 1], [], []>} : vector<2x8xf32>, vector<8x4xf32>, vector<2x4xf32> -> vector<2x4xf32>
      %c0_22 = arith.constant 0 : index
      %c0_23 = arith.constant 0 : index
      %25 = vector.load %arg8[%c0_22, %c0_23] : memref<1x4xf32, #tpu.memory_space<vmem>>, vector<1x4xf32>
      %26 = vector.broadcast %25 : vector<1x4xf32> to vector<2x4xf32>
      %27 = arith.addf %24, %26 : vector<2x4xf32>
      %c0_24 = arith.constant 0 : index
      %c0_25 = arith.constant 0 : index
      %28 = vector.load %arg9[%c0_24, %c0_25] : memref<4x32xf32, #tpu.memory_space<vmem>>, vector<4x32xf32>
      %cst_26 = arith.constant dense<0.000000e+00> : vector<2x32xf32>
      %29 = tpu.matmul %27, %28, %cst_26 {dimension_numbers = #tpu.dot_dimension_numbers<[1], [0], [0], [1], [0, 0, 1, 1], [], []>} : vector<2x4xf32>, vector<4x32xf32>, vector<2x32xf32> -> vector<2x32xf32>
      %30 = vector.extract_strided_slice %27 {offsets = [0, 0], sizes = [2, 1], strides = [1, 1]} : vector<2x4xf32> to vector<2x1xf32>
      %c0_27 = arith.constant 0 : index
      %c32 = arith.constant 32 : index
      %31 = vector.load %arg11[%c0_27, %c32] : memref<2x160xf32, #tpu.memory_space<vmem>>, vector<2x32xf32>
      %32 = vector.broadcast %30 : vector<2x1xf32> to vector<2x32xf32>
      %33 = arith.mulf %32, %31 : vector<2x32xf32>
      %34 = arith.addf %29, %33 : vector<2x32xf32>
      %35 = vector.extract_strided_slice %27 {offsets = [0, 1], sizes = [2, 1], strides = [1, 1]} : vector<2x4xf32> to vector<2x1xf32>
      %c0_28 = arith.constant 0 : index
      %c64 = arith.constant 64 : index
      %36 = vector.load %arg11[%c0_28, %c64] : memref<2x160xf32, #tpu.memory_space<vmem>>, vector<2x32xf32>
      %37 = vector.broadcast %35 : vector<2x1xf32> to vector<2x32xf32>
      %38 = arith.mulf %37, %36 : vector<2x32xf32>
      %39 = arith.addf %34, %38 : vector<2x32xf32>
      %40 = vector.extract_strided_slice %27 {offsets = [0, 2], sizes = [2, 1], strides = [1, 1]} : vector<2x4xf32> to vector<2x1xf32>
      %c0_29 = arith.constant 0 : index
      %c96 = arith.constant 96 : index
      %41 = vector.load %arg11[%c0_29, %c96] : memref<2x160xf32, #tpu.memory_space<vmem>>, vector<2x32xf32>
      %42 = vector.broadcast %40 : vector<2x1xf32> to vector<2x32xf32>
      %43 = arith.mulf %42, %41 : vector<2x32xf32>
      %44 = arith.addf %39, %43 : vector<2x32xf32>
      %45 = vector.extract_strided_slice %27 {offsets = [0, 3], sizes = [2, 1], strides = [1, 1]} : vector<2x4xf32> to vector<2x1xf32>
      %c0_30 = arith.constant 0 : index
      %c128 = arith.constant 128 : index
      %46 = vector.load %arg11[%c0_30, %c128] : memref<2x160xf32, #tpu.memory_space<vmem>>, vector<2x32xf32>
      %47 = vector.broadcast %45 : vector<2x1xf32> to vector<2x32xf32>
      %48 = arith.mulf %47, %46 : vector<2x32xf32>
      %49 = arith.addf %44, %48 : vector<2x32xf32>
      %50 = arith.addf %15, %49 : vector<2x32xf32>
      %c0_31 = arith.constant 0 : index
      %c0_32 = arith.constant 0 : index
      %51 = vector.load %arg10[%c0_31, %c0_32] : memref<2x32xf32, #tpu.memory_space<vmem>>, vector<2x32xf32>
      tpu.vector_store %arg10[%c0_31, %c0_32], %50 {strides = array<i32>} : memref<2x32xf32, #tpu.memory_space<vmem>>, vector<2x32xf32>,
    } else {
    }
    return
  }
  func.func @transform_0(%arg0: i32, %arg1: i32) -> (i32, i32) {
    %c0_i32 = arith.constant 0 : i32
    return %arg0, %arg1 : i32, i32
  }
  func.func @transform_1(%arg0: i32, %arg1: i32) -> (i32, i32) {
    %c0_i32 = arith.constant 0 : i32
    %c0_i32_0 = arith.constant 0 : i32
    return %arg1, %c0_i32 : i32, i32
  }
  func.func @transform_2(%arg0: i32, %arg1: i32) -> (i32, i32) {
    %c0_i32 = arith.constant 0 : i32
    %c0_i32_0 = arith.constant 0 : i32
    %c0_i32_1 = arith.constant 0 : i32
    return %c0_i32, %c0_i32_0 : i32, i32
  }
  func.func @transform_3(%arg0: i32, %arg1: i32) -> (i32, i32) {
    %c0_i32 = arith.constant 0 : i32
    %c0_i32_0 = arith.constant 0 : i32
    %c0_i32_1 = arith.constant 0 : i32
    return %c0_i32, %c0_i32_0 : i32, i32
  }
  func.func @transform_4(%arg0: i32, %arg1: i32) -> (i32, i32) {
    %c0_i32 = arith.constant 0 : i32
    %c0_i32_0 = arith.constant 0 : i32
    %c0_i32_1 = arith.constant 0 : i32
    return %c0_i32, %c0_i32_0 : i32, i32
  }
  func.func @transform_5(%arg0: i32, %arg1: i32) -> (i32, i32) {
    %c0_i32 = arith.constant 0 : i32
    %c0_i32_0 = arith.constant 0 : i32
    %c0_i32_1 = arith.constant 0 : i32
    return %c0_i32, %c0_i32_0 : i32, i32
  }
  func.func @transform_6(%arg0: i32, %arg1: i32) -> (i32, i32) {
    %c0_i32 = arith.constant 0 : i32
    %c0_i32_0 = arith.constant 0 : i32
    %c0_i32_1 = arith.constant 0 : i32
    return %c0_i32, %c0_i32_0 : i32, i32
  }
  func.func @transform_7(%arg0: i32, %arg1: i32) -> (i32, i32) {
    %c0_i32 = arith.constant 0 : i32
    %c0_i32_0 = arith.constant 0 : i32
    %c0_i32_1 = arith.constant 0 : i32
    return %c0_i32, %c0_i32_0 : i32, i32
  }
  func.func @transform_8(%arg0: i32, %arg1: i32) -> (i32, i32) {
    %c0_i32 = arith.constant 0 : i32
    %c0_i32_0 = arith.constant 0 : i32
    return %arg0, %c0_i32 : i32, i32
  }
}

</mosaic_0001>

<bundles_post_ra>
// kernel: tpu_custom_call.1
= control target key start
LH: loop header
LB: loop body
LE: loop exit
PB: predicated region body
PF: predicated region fallthrough
CT: control target
= control target key end

     0   :  { %13 = vsyncpa [#allocation4], 0  ;;  %s923_s27 = smov 0   ;;  %s925_s28 = smov 0   ;;  %s1068_s0 = inlined_call_operand.vmem [shape: f32[2,768], index: 0, kind: input, shape index: {}]   ;;  %s1069_s1 = inlined_call_operand.vmem [shape: f32[768,160], index: 1, kind: input, shape index: {}]   ;;  %s1070_s2 = inlined_call_operand.vmem [shape: f32[1,32], index: 2, kind: input, shape index: {}]   ;;  %s1071_s3 = inlined_call_operand.vmem [shape: f32[32,8], index: 3, kind: input, shape index: {}]   ;;  %s1072_s4 = inlined_call_operand.vmem [shape: f32[1,8], index: 4, kind: input, shape index: {}]   ;;  %s1073_s5 = inlined_call_operand.vmem [shape: f32[8,4], index: 5, kind: input, shape index: {}]   ;;  %s1074_s6 = inlined_call_operand.vmem [shape: f32[1,4], index: 6, kind: input, shape index: {}]   ;;  %s1075_s7 = inlined_call_operand.vmem [shape: f32[4,32], index: 7, kind: input, shape index: {}]   ;;  %s1076_s8 = inlined_call_operand.hbm [shape: f32[2,32], index: 8, kind: output, shape index: {}]  }
   0x1   :  { %s927_s29 = smov 0  }
   0x2 LB: > { %s747_s30 = sadd.s32 4294967295, %s867_s29   ;;  %s28_s9 = sadd.s32 1, %s863_s28  ;;  %s867_s29 = sphi %s927_s29, %s19_s29   ;;  %s863_s28 = sphi %s925_s28, %s1078_s28   ;;  %s859_s27 = sphi %s923_s27, %s1077_s27  }
   0x3   : > { %p29_p0 = scmp.ge.s32.totalorder %s28_s9, 3  ;;  %p750_p1 = scmp.ge.s32.totalorder %s867_s29, 1 }
   0x4   : > { %p294_p2 = scmp.lt.s32.totalorder %s867_s29, 4 }
   0x5   : > { %s1080_s9 = smov (%p29_p0, %s28_s9), 0 }
   0x6   : > { %p295_p3 = pnand %p750_p1, %p294_p2 }
   0x7   : > { %s751_s10 = sshll.u32 (!%p295_p3), %s859_s27, 1  ;;  %s753_s11 = sshll.u32 (!%p295_p3), %s859_s27, 5 }
   0x8   : > { %298 = sbr.rel (%p295_p3) target bundleno = 614 (0x266), region = 52  ;;  %p336_p4 = scmp.lt.s32.totalorder (!%p295_p3), %s751_s10, 5 }
   0x9   : > { %p344_p5 = scmp.lt.s32.totalorder (!%p295_p3), %s753_s11, 95  ;;  %p756_p6 = scmp.ne.s32.totalorder (!%p295_p3), %s859_s27, 0 }
   0xd   : > { %s1082_s10 = smov (!%p336_p4, %s751_s10), 5  ;;  %s1084_s11 = smov (!%p344_p5, %s753_s11), 95 }
   0xe   : > { %s752_s12 = sshll.u32 %s1082_s10, 1  ;;  %s766_s16 = sshll.u32 %s1084_s11, 4 }
   0xf   : > { %s949_s15 = scalar_lea.vmem %s1068_s0, %s752_s12  ;;  %s954_s19 = scalar_lea.vmem %s1069_s1, %s766_s16 }
  0x10   : > { %353 = sbr.rel (%p756_p6) target bundleno = 24 (0x18), region = 56 }
  0x15   : > { %vm354_vm0 = vcmask 1041408   ;;  %vm355_vm1 = vcmask 257026   ;;  %v869_v0 = vmov 0.0  }
  0x16   : > { %vm356_vm2 = vmor %vm355_vm1, %vm354_vm0 }
  0x17   : > { %357 = vst.msk [vmem:[#allocation2] sm:$0xf] %vm356_vm2, %v869_v0 }
  0x18 PF: > { %v391_v1 = vld [vmem:[%s954_s19 + $0xf8] sm:$0xff]  ;;  %v389_v3 = vld [vmem:[%s954_s19 + $0xe8] sm:$0xff]  ;;  %v390_v7 = vld [vmem:[%s954_s19 + $0xf0] sm:$0xff]  ;;  %vm513_vm3 = vcmask 1041408   ;;  %vm517_vm4 = vcmask 257026   ;;  %p757_p7 = scmp.ne.s32.totalorder %s859_s27, 2 }
  0x19   : > { %v423_v2 = vld [vmem:[%s954_s19 + $0x1f8] sm:$0xff]  ;;  %470 = vmatpush.msra.mxu2 %v391_v1  ;;  %v421_v4 = vld [vmem:[%s954_s19 + $0x1e8] sm:$0xff]  ;;  %v422_v9 = vld [vmem:[%s954_s19 + $0x1f0] sm:$0xff]  ;;  %430 = vmatpush.msra.mxu0 %v390_v7  ;;  %s870_s14 = smov (!%p757_p7), 96   ;;  %s874_s21 = smov (!%p757_p7), 32  }
  0x1a   : > { %490 = vmatpush.msra.mxu3 %v423_v2  ;;  %v387_v5 = vld [vmem:[%s954_s19 + $0xd8] sm:$0xff]  ;;  %v385_v8 = vld [vmem:[%s954_s19 + $0xc8] sm:$0xff]  ;;  %450 = vmatpush.msra.mxu1 %v422_v9  ;;  %v388_v11 = vld [vmem:[%s954_s19 + $0xe0] sm:$0xff]  ;;  %s875_s22 = smov (!%p757_p7), 64  }
  0x1b   : > { %v419_v6 = vld [vmem:[%s954_s19 + $0x1d8] sm:$0xff]  ;;  %471 = vmatpush.msra.mxu2 %v389_v3  ;;  %v417_v10 = vld [vmem:[%s954_s19 + $0x1c8] sm:$0xff]  ;;  %v420_v12 = vld [vmem:[%s954_s19 + $0x1e0] sm:$0xff]  ;;  %431 = vmatpush.msra.mxu0 %v388_v11 }
  0x1c   : > { %491 = vmatpush.msra.mxu3 %v421_v4  ;;  %v386_v13 = vld [vmem:[%s954_s19 + $0xd0] sm:$0xff]  ;;  %v383_v15 = vld [vmem:[%s954_s19 + $0xb8] sm:$0xff]  ;;  %451 = vmatpush.msra.mxu1 %v420_v12  ;;  %v384_v17 = vld [vmem:[%s954_s19 + $0xc0] sm:$0xff] }
  0x1d   : > { %472 = vmatpush.msra.mxu2 %v387_v5  ;;  %v418_v14 = vld [vmem:[%s954_s19 + $0x1d0] sm:$0xff]  ;;  %v415_v16 = vld [vmem:[%s954_s19 + $0x1b8] sm:$0xff]  ;;  %v416_v18 = vld [vmem:[%s954_s19 + $0x1c0] sm:$0xff]  ;;  %432 = vmatpush.msra.mxu0 %v386_v13 }
  0x1e   : > { %492 = vmatpush.msra.mxu3 %v419_v6  ;;  %v381_v19 = vld [vmem:[%s954_s19 + $0xa8] sm:$0xff]  ;;  %452 = vmatpush.msra.mxu1 %v418_v14  ;;  %v382_v21 = vld [vmem:[%s954_s19 + $0xb0] sm:$0xff]  ;;  %v379_v23 = vld [vmem:[%s954_s19 + $0x98] sm:$0xff] }
  0x1f   : > { %473 = vmatpush.msra.mxu2 %v385_v8  ;;  %v413_v20 = vld [vmem:[%s954_s19 + $0x1a8] sm:$0xff]  ;;  %v414_v22 = vld [vmem:[%s954_s19 + $0x1b0] sm:$0xff]  ;;  %v411_v24 = vld [vmem:[%s954_s19 + $0x198] sm:$0xff]  ;;  %433 = vmatpush.msra.mxu0 %v384_v17 }
  0x20   : > { %493 = vmatpush.msra.mxu3 %v417_v10  ;;  %453 = vmatpush.msra.mxu1 %v416_v18  ;;  %v380_v25 = vld [vmem:[%s954_s19 + $0xa0] sm:$0xff]  ;;  %v377_v27 = vld [vmem:[%s954_s19 + $0x88] sm:$0xff]  ;;  %v378_v29 = vld [vmem:[%s954_s19 + $0x90] sm:$0xff] }
  0x21   : > { %474 = vmatpush.msra.mxu2 %v383_v15  ;;  %v412_v26 = vld [vmem:[%s954_s19 + $0x1a0] sm:$0xff]  ;;  %v409_v28 = vld [vmem:[%s954_s19 + $0x188] sm:$0xff]  ;;  %434 = vmatpush.msra.mxu0 %v382_v21  ;;  %v410_v30 = vld [vmem:[%s954_s19 + $0x190] sm:$0xff] }
  0x22   : > { %494 = vmatpush.msra.mxu3 %v415_v16  ;;  %454 = vmatpush.msra.mxu1 %v414_v22  ;;  %v375_v31 = vld [vmem:[%s954_s19 + $0x78] sm:$0xff]  ;;  %v376_v33 = vld [vmem:[%s954_s19 + $0x80] sm:$0xff]  ;;  %v373_v35 = vld [vmem:[%s954_s19 + $0x68] sm:$0xff] }
  0x23   : > { %475 = vmatpush.msra.mxu2 %v381_v19  ;;  %v407_v32 = vld [vmem:[%s954_s19 + $0x178] sm:$0xff]  ;;  %435 = vmatpush.msra.mxu0 %v380_v25  ;;  %v408_v34 = vld [vmem:[%s954_s19 + $0x180] sm:$0xff]  ;;  %v405_v36 = vld [vmem:[%s954_s19 + $0x168] sm:$0xff] }
  0x24   : > { %495 = vmatpush.msra.mxu3 %v413_v20  ;;  %455 = vmatpush.msra.mxu1 %v412_v26  ;;  %v374_v37 = vld [vmem:[%s954_s19 + $0x70] sm:$0xff]  ;;  %v371_v39 = vld [vmem:[%s954_s19 + $0x58] sm:$0xff]  ;;  %v359_v41 = vld [vmem:[%s949_s15] sm:$0xf] }
  0x25   : > { %476 = vmatpush.msra.mxu2 %v379_v23  ;;  %436 = vmatpush.msra.mxu0 %v378_v29  ;;  %v406_v38 = vld [vmem:[%s954_s19 + $0x170] sm:$0xff]  ;;  %v403_v40 = vld [vmem:[%s954_s19 + $0x158] sm:$0xff]  ;;  %v372_v42 = vld [vmem:[%s954_s19 + $0x60] sm:$0xff]  ;;  %425 = vst [vmem:[#allocation1] ss:$4 sm:$0xff] %v359_v41 }
  0x26   : > { %496 = vmatpush.msra.mxu3 %v411_v24  ;;  %456 = vmatpush.msra.mxu1 %v410_v30  ;;  %v404_v43 = vld [vmem:[%s954_s19 + $0x160] sm:$0xff]  ;;  %v369_v44 = vld [vmem:[%s954_s19 + $0x48] sm:$0xff]  ;;  %v370_v46 = vld [vmem:[%s954_s19 + $0x50] sm:$0xff] }
  0x27   : > { %477 = vmatpush.msra.mxu2 %v377_v27  ;;  %437 = vmatpush.msra.mxu0 %v376_v33  ;;  %v401_v45 = vld [vmem:[%s954_s19 + $0x148] sm:$0xff]  ;;  %v402_v47 = vld [vmem:[%s954_s19 + $0x150] sm:$0xff]  ;;  %v367_v48 = vld [vmem:[%s954_s19 + $0x38] sm:$0xff] }
  0x28   : > { %497 = vmatpush.msra.mxu3 %v409_v28  ;;  %457 = vmatpush.msra.mxu1 %v408_v34  ;;  %v399_v49 = vld [vmem:[%s954_s19 + $0x138] sm:$0xff]  ;;  %v368_v50 = vld [vmem:[%s954_s19 + $0x40] sm:$0xff]  ;;  %v365_v52 = vld [vmem:[%s954_s19 + $0x28] sm:$0xff] }
  0x29   : > { %478 = vmatpush.msra.mxu2 %v375_v31  ;;  %438 = vmatpush.msra.mxu0 %v374_v37  ;;  %v400_v51 = vld [vmem:[%s954_s19 + $0x140] sm:$0xff]  ;;  %v397_v53 = vld [vmem:[%s954_s19 + $0x128] sm:$0xff]  ;;  %v366_v54 = vld [vmem:[%s954_s19 + $0x30] sm:$0xff] }
  0x2a   : > { %498 = vmatpush.msra.mxu3 %v407_v32  ;;  %458 = vmatpush.msra.mxu1 %v406_v38  ;;  %v398_v55 = vld [vmem:[%s954_s19 + $0x130] sm:$0xff]  ;;  %v363_v56 = vld [vmem:[%s954_s19 + $0x18] sm:$0xff]  ;;  %v364_v58 = vld [vmem:[%s954_s19 + $0x20] sm:$0xff] }
  0x2b   : > { %479 = vmatpush.msra.mxu2 %v373_v35  ;;  %439 = vmatpush.msra.mxu0 %v372_v42  ;;  %v395_v57 = vld [vmem:[%s954_s19 + $0x118] sm:$0xff]  ;;  %v396_v59 = vld [vmem:[%s954_s19 + $0x120] sm:$0xff]  ;;  %v361_v60 = vld [vmem:[%s954_s19 + $0x8] sm:$0xff] }
  0x2c   : > { %499 = vmatpush.msra.mxu3 %v405_v36  ;;  %459 = vmatpush.msra.mxu1 %v404_v43  ;;  %v393_v61 = vld [vmem:[%s954_s19 + $0x108] sm:$0xff]  ;;  %v426_v62 = vld.sshfl [vmem:[#allocation1] sm:$0xff pattern:$0x73625140]  ;;  %v362_v0 = vld [vmem:[%s954_s19 + $0x10] sm:$0xff] }
  0x2d   : > { %480 = vmatpush.msra.mxu2 %v371_v39  ;;  %440 = vmatpush.msra.mxu0 %v370_v46  ;;  %v427_v63 = vld.sshfl [vmem:[#allocation1 + $0x8] sm:$0xff pattern:$0x73625140]  ;;  %v394_v1 = vld [vmem:[%s954_s19 + $0x110] sm:$0xff]  ;;  %v360_v2 = vld [vmem:[%s954_s19] sm:$0xff] }
  0x2e   : > { %500 = vmatpush.msra.mxu3 %v403_v40  ;;  %460 = vmatpush.msra.mxu1 %v402_v47  ;;  %v392_v3 = vld [vmem:[%s954_s19 + $0x100] sm:$0xff]  ;;  %v358_v11 = vld [vmem:[#allocation2] sm:$0xf]  ;;  %vm518_vm5 = vmor %vm517_vm4, %vm513_vm3 }
  0x2f   : > { %481 = vmatpush.msra.mxu2 %v369_v44  ;;  %441 = vmatpush.msra.mxu0 %v368_v50 }
  0x30   : > { %501 = vmatpush.msra.mxu3 %v401_v45  ;;  %461 = vmatpush.msra.mxu1 %v400_v51 }
  0x31   : > { %482 = vmatpush.msra.mxu2 %v367_v48  ;;  %442 = vmatpush.msra.mxu0 %v366_v54 }
  0x32   : > { %502 = vmatpush.msra.mxu3 %v399_v49  ;;  %462 = vmatpush.msra.mxu1 %v398_v55 }
  0x33   : > { %483 = vmatpush.msra.mxu2 %v365_v52  ;;  %443 = vmatpush.msra.mxu0 %v364_v58 }
  0x34   : > { %503 = vmatpush.msra.mxu3 %v397_v53  ;;  %463 = vmatpush.msra.mxu1 %v396_v59 }
  0x35   : > { %484 = vmatpush.msra.mxu2 %v363_v56  ;;  %444 = vmatpush.msra.mxu0 %v362_v0 }
  0x36   : > { %504 = vmatpush.msra.mxu3 %v395_v57  ;;  %464 = vmatpush.msra.mxu1 %v394_v1 }
  0x37   : > { %485 = vmatpush.msra.mxu2 %v361_v60  ;;  %445 = vmatpush.msra.mxu0 %v360_v2 }
  0x38   : > { %505 = vmatpush.msra.mxu3 %v393_v61  ;;  %486 = vmatmul.f32.vlgmr.msra.gmra.mxu2 %v426_v62 }
  0x39   : > { %506 = vmatmul.f32.vlgmr.msra.gmra.mxu3 %v427_v63  ;;  %465 = vmatpush.msra.mxu1 %v392_v3 }
  0x3a   : > { %446 = vmatmul.f32.vlgmr.msra.gmra.mxu0 %v426_v62  ;;  %466 = vmatmul.f32.vlgmr.msra.gmra.mxu1 %v427_v63 }
  0xb7   : > { %v447_v4 = vpop.f32.mrf.mxu0  ;;  %v467_v5 = vpop.f32.mrf.mxu1 }
  0xb8   : > { %v468_v9 = vadd.f32 %v467_v5, %v447_v4 }
  0xbb   : > { %v487_v6 = vpop.f32.mrf.mxu2 }
  0xbc   : > { %v507_v7 = vpop.f32.mrf.mxu3 }
  0xbd   : > { %v508_v8 = vadd.f32 %v507_v7, %v487_v6 }
  0xbf   : > { %v512_v10 = vrot.slane %v508_v8, 6 }
  0xc0   : > { %523 = sbr.rel (%p757_p7) target bundleno = 608 (0x260), region = 60 }
  0xc1   : > { %v514_v12 = vsel %vm513_vm3, %v468_v9, %v512_v10 }
  0xc2   : > { %v516_v13 = vadd.f32 %v514_v12, %v358_v11 }
  0xc4   : > { %519 = vst.msk [vmem:[#allocation2] sm:$0xf] %vm518_vm5, %v516_v13 }
  0xc5   : > { %v533_v14 = vld [vmem:[%s1071_s3 + $0x18] sm:$0xff]  ;;  %v532_v15 = vld [vmem:[%s1071_s3 + $0x10] sm:$0xff]  ;;  %v531_v16 = vld [vmem:[%s1071_s3 + $0x8] sm:$0xff]  ;;  %vm538_vm6 = vcmask 261120   ;;  %vm568_vm7 = vcmask 64512   ;;  %vm608_vm8 = vcmask 1043456  }
  0xc6   : > { %554 = vmatpush.msra.mxu0 %v533_v14  ;;  %v810_v18 = vld [vmem:[%s1070_s2] ss:$0 sm:$0xff]  ;;  %v871_v31 = vmov 2   ;;  %v872_v32 = vmov 1   ;;  %v873_v33 = vmov 0   ;;  %vm605_vm9 = vcmask 31744  }
  0xc7   : > { %v530_v19 = vld [vmem:[%s1071_s3] sm:$0xff]  ;;  %808 = vset.pattern.permute.xlu2 %v871_v31  ;;  %807 = vset.pattern.permute.xlu1 %v872_v32  ;;  %v876_v38 = vmov 3   ;;  %vm666_vm10 = vcmask 254976  }
  0xc8   : > { %555 = vmatpush.msra.mxu0 %v532_v15  ;;  %v563_v21 = vld [vmem:[%s1073_s5] sm:$0xff]  ;;  %806 = vset.pattern.permute.xlu0 %v873_v33 }
  0xc9   : > { %587 = vmatpush.msra.mxu1 %v563_v21  ;;  %v811_v26 = vld [vmem:[%s1072_s4] ss:$0 sm:$0xff] }
  0xca   : > { %556 = vmatpush.msra.mxu0 %v531_v16  ;;  %v592_v30 = vld [vmem:[%s1075_s7] sm:$0xf] }
  0xcb   : > { %v524_v17 = vld [vmem:[#allocation2] sm:$0x3]  ;;  %760 = vmatpush.msk.msra.mxu2 %vm608_vm8, %v592_v30  ;;  %v812_v34 = vld [vmem:[%s1074_s6] ss:$0 sm:$0xff]  ;;  %v658_v49 = vld [vmem:[#allocation2 + $0x2] sm:$0x3] }
  0xcc   : > { %599 = vst [vmem:[#allocation1] ss:$4 sm:$0xff] %v524_v17  ;;  %v1038_v20 = vadd.f32 %v810_v18, %v524_v17  ;;  %557 = vmatpush.msra.mxu0 %v530_v19  ;;  %v632_v23 = vld [vmem:[#allocation2] sm:$0x3] }
  0xcd   : > { %v645_v24 = vld [vmem:[#allocation2] sm:$0x3] }
  0xce   : > { %758 = vmatmul.msk.f32.vlgmr.msra.gmra.mxu0 %vm538_vm6, %v1038_v20 }
  0xd3   : > { %v600_v22 = vld.sshfl [vmem:[#allocation1] sm:$0xff pattern:$0x73625140] }
  0xd4   : > { %601 = vrot.lane.b32.xlu0 %v600_v22, %s870_s14  ;;  %638 = vst [vmem:[#allocation1] ss:$4 sm:$0xff] %v632_v23 }
  0xdb   : > { %v639_v25 = vld.sshfl [vmem:[#allocation1] sm:$0xff pattern:$0x73625140] }
  0xdc   : > { %651 = vst [vmem:[#allocation1] ss:$4 sm:$0xff] %v645_v24 }
  0xe3   : > { %v652_v37 = vld.sshfl [vmem:[#allocation1] sm:$0xff pattern:$0x73625140] }
 0x146   : > { %v602_v39 = vpop.permute.xlu0 %601 }
 0x14b   : > { %v559_v27 = vpop.f32.mrf.mxu0 }
 0x14c   : > { %v560_v28 = vadd.f32 %v811_v26, %v559_v27 }
 0x14e   : > { %v562_v29 = vmax.f32 %v560_v28, 0.0 }
 0x150   : > { %759 = vmatmul.msk.f32.vlgmr.msra.gmra.mxu1 %vm568_vm7, %v562_v29 }
 0x1cd   : > { %v589_v35 = vpop.f32.mrf.mxu1 }
 0x1ce   : > { %v590_v36 = vadd.f32 %v812_v34, %v589_v35 }
 0x1d0   : > { %647 = vperm.xlu2 %808, %v590_v36   ;;  %634 = vperm.xlu1 %807, %v590_v36  }
 0x1d1   : > { %595 = vperm.xlu0 %806, %v590_v36   ;;  %761 = vmatmul.msk.f32.vlgmr.msra.gmra.mxu2 %vm605_vm9, %v590_v36 }
 0x1d8   : > { %653 = vrot.lane.b32.xlu2 %v652_v37, %s874_s21  ;;  %640 = vrot.lane.b32.xlu1 %v639_v25, %s875_s22 }
 0x1d9   : > { %809 = vset.pattern.permute.xlu0 %v876_v38 }
 0x1da   : > { %660 = vperm.xlu0 %809, %v590_v36  }
 0x22a   : > { %v648_v41 = vpop.permute.xlu2 %647 }
 0x232   : > { %v654_v45 = vpop.permute.xlu2 %653 }
 0x233   : > { %v656_v51 = vmul.f32 %v654_v45, %v648_v41 }
 0x242   : > { %v635_v40 = vpop.permute.xlu1 %634 }
 0x243   : > { %v596_v42 = vpop.permute.xlu0 %595 }
 0x244   : > { %v604_v44 = vmul.f32 %v602_v39, %v596_v42 }
 0x24a   : > { %v641_v43 = vpop.permute.xlu1 %640 }
 0x24b   : > { %v643_v47 = vmul.f32 %v641_v43, %v635_v40 }
 0x24c   : > { %v661_v50 = vpop.permute.xlu0 %660 }
 0x24d   : > { %v663_v53 = vmul.f32 %v661_v50, %v658_v49 }
 0x254   : > { %v629_v46 = vpop.f32.mrf.mxu2 }
 0x255   : > { %v630_v48 = vadd.f32 %v629_v46, %v604_v44 }
 0x257   : > { %v644_v52 = vadd.f32 %v643_v47, %v630_v48 }
 0x259   : > { %v657_v54 = vadd.f32 %v656_v51, %v644_v52 }
 0x25b   : > { %v664_v55 = vadd.f32 %v663_v53, %v657_v54 }
 0x25d   : > { %v665_v56 = vadd.f32 %v664_v55, %v1038_v20 }
 0x25f   : > { %667 = vst.msk [vmem:[#allocation3] sm:$0x3] %vm666_vm10, %v665_v56 }
 0x260 PF: > { %p771_p8 = scmp.eq.s32.totalorder %s747_s30, 2  ;;  %s678_s25 = sshll.u32 %s1076_s8, 4  ;;  %s679_s25 = int_to_ptr.hbm [resolvable:$true] %s678_s25 }
 0x261   : > { %s877_s26 = smov [#allocation3]  }
 0x262   : > { %s676_s10 = sshll.u32 %s877_s26, 4  ;;  %s677_s10 = int_to_ptr.vmem [resolvable:$true] %s676_s10 }
 0x263   : > { %768 = dma.vmem_to_hbm [thread:$0]  (%p771_p8), %s677_s10, 32, %s679_s25, [#allocation4]  }
 0x264   : > { %854 = dma.done.wait (%p771_p8), [#allocation4], 32  }
 0x265   : > { %856 = vsyncadd (%p771_p8), [#allocation4], 4294967264 }
 0x266 PF: > { %s19_s29 = sadd.s32 1, %s867_s29   ;;  %s1077_s27 = smov %s863_s28 }
 0x267   : > { %p16_p9 = scmp.ge.s32.totalorder %s19_s29, 5   ;;  %s1078_s28 = smov %s1080_s9 }
 0x269   :  { %18 = sbr.rel (!%p16_p9) target bundleno = 2 (0x2), region = 91 }
 0x26e   :  { %692 = vsyncpa [#allocation4], 1 }
 0x26f   :  { %694 = vsyncpa [#allocation4 + $0x1], 1 }

</bundles_post_ra>
